<compile_context>
chip_gen: v6e
topology: v6e:2x2x1
jax: 0.10.0
libtpu: 0.0.40
codegen_flags: <defaults>
</compile_context>

<pallas_src>
import functools

import jax
import jax.numpy as jnp
from jax import lax
from jax.experimental import pallas as pl
from jax.experimental.pallas import tpu as pltpu


# -----------------------------------------------------------------------------
# Small helpers
# -----------------------------------------------------------------------------
def _round_up(x, m):
    return ((x + m - 1) // m) * m


def _cdiv(a, b):
    return -(-a // b)


def _pad_cols(a, cols):
    return jnp.pad(a, ((0, 0), (0, cols - a.shape[1])))


@functools.lru_cache(maxsize=None)
def _vmem_limit():
    """Scoped-VMEM limit: ~half of physical (32 MiB v7x, 64 MiB v5e/v6e)."""
    try:
        info = pltpu.get_tpu_info()
        cap = int(getattr(info, "vmem_capacity_bytes", 0))
    except Exception:
        cap = 0
    if cap <= 0:
        return 32 * 1024 * 1024          # safe default on every generation
    return max(32 * 1024 * 1024, min(cap // 2, 96 * 1024 * 1024))


def _pick_tm(m, k, oc, pre_bn, budget):
    """Largest 16-multiple tile height whose VMEM footprint fits the budget,
    then shrunk to minimize last-tile slack (same tile count)."""
    per_row = (2 * k * 2                      # double-buffered bf16 patch tile
               + (k * 6 if pre_bn else 0)     # f32 affine temp + bf16 operand
               + k * 2                        # dot operand copy
               + oc * 4                       # f32 accumulation value
               + 2 * oc * 2)                  # double-buffered bf16 output
    fixed = 2 * k * oc * 2 + 16 * oc * 4 + 8 * k * 4 + (2 << 20)
    tm = 16
    for cand in (1024, 768, 512, 384, 256, 192, 128, 96, 64, 48, 32, 16):
        if cand * per_row + fixed <= budget:
            tm = cand
            break
    m16 = _round_up(max(m, 16), 16)
    if tm >= m16:
        return m16
    ntiles = _cdiv(m, tm)
    return _round_up(_cdiv(m, ntiles), 16)


# -----------------------------------------------------------------------------
# The (single) conv kernel factory
#   patch tile -> [fused previous BN + LeakyReLU] -> matmul / row-reduce
#   -> [+bias] -> [LeakyReLU] -> bf16/f32 store  (+ masked per-tile BN stats)
# -----------------------------------------------------------------------------
def _make_conv_kernel(*, tm, m_valid, pre_bn, has_bias, act, stats,
                      final_reduce, out_dtype, slope=0.2):
    def kernel(*refs):
        it = iter(refs)
        p_ref = next(it)
        s_ref = next(it) if pre_bn else None
        t_ref = next(it) if pre_bn else None
        w_ref = next(it)
        b_ref = next(it) if has_bias else None
        o_ref = next(it)
        st_ref = next(it) if stats else None

        x = p_ref[...]                                       # (tm, K) bf16
        xf = None
        if pre_bn:
            # Previous layer's BatchNorm + LeakyReLU, fused on the patch tile.
            xf = x.astype(jnp.float32) * s_ref[...] + t_ref[...]
            xf = jnp.where(xf >= 0, xf, slope * xf)

        if final_reduce:
            # Final 1-channel conv: multiply + row-sum, true (tm, 1) output.
            xr = xf if pre_bn else x.astype(jnp.float32)
            y = jnp.sum(xr * w_ref[...], axis=1, keepdims=True)
        else:
            xin = xf.astype(jnp.bfloat16) if pre_bn else x
            y = jnp.dot(xin, w_ref[...],
                        preferred_element_type=jnp.float32)  # (tm, OC)

        if has_bias:
            y = y + b_ref[...]
        if act:
            y = jnp.where(y >= 0, y, slope * y)
        o_ref[...] = y.astype(out_dtype)

        if stats:
            # Per-tile partial sum / sum-of-squares, masking the ragged rows
            # of the last tile so batch statistics stay exact.
            rows = lax.broadcasted_iota(jnp.int32, (tm, 1), 0) + pl.program_id(0) * tm
            yv = jnp.where(rows < m_valid, y, 0.0)
            s = jnp.sum(yv, axis=0, keepdims=True)
            ss = jnp.sum(yv * yv, axis=0, keepdims=True)
            st_ref[...] = jnp.concatenate(
                [s, ss, jnp.zeros((6, yv.shape[1]), jnp.float32)], axis=0)

    return kernel


def conv_pallas(patches, w, *, bias=None, scale_k=None, shift_k=None,
                act=False, compute_stats=False, out_dtype=jnp.bfloat16,
                final_reduce=False):
    M, K = patches.shape
    OCn = 1 if final_reduce else w.shape[1]
    limit = _vmem_limit()
    pre_bn = scale_k is not None
    tm = _pick_tm(M, K, OCn, pre_bn, int(limit * 0.7))
    G = _cdiv(M, tm)

    in_specs = [pl.BlockSpec((tm, K), lambda i: (i, 0))]
    args = [patches]
    if pre_bn:
        in_specs.append(pl.BlockSpec((1, K), lambda i: (0, 0)))
        in_specs.append(pl.BlockSpec((1, K), lambda i: (0, 0)))
        args += [scale_k, shift_k]
    if final_reduce:
        in_specs.append(pl.BlockSpec((1, K), lambda i: (0, 0)))
    else:
        in_specs.append(pl.BlockSpec((K, OCn), lambda i: (0, 0)))
    args.append(w)
    if bias is not None:
        in_specs.append(pl.BlockSpec((1, OCn), lambda i: (0, 0)))
        args.append(bias)

    y_shape = jax.ShapeDtypeStruct((M, OCn), out_dtype)
    y_spec = pl.BlockSpec((tm, OCn), lambda i: (i, 0))
    if compute_stats:
        out_shape = (y_shape, jax.ShapeDtypeStruct((G * 8, OCn), jnp.float32))
        out_specs = (y_spec, pl.BlockSpec((8, OCn), lambda i: (i, 0)))
    else:
        out_shape = y_shape
        out_specs = y_spec

    kernel = _make_conv_kernel(tm=tm, m_valid=M, pre_bn=pre_bn,
                               has_bias=bias is not None, act=act,
                               stats=compute_stats, final_reduce=final_reduce,
                               out_dtype=out_dtype)
    return pl.pallas_call(
        kernel,
        out_shape=out_shape,
        grid=(G,),
        in_specs=in_specs,
        out_specs=out_specs,
        compiler_params=pltpu.CompilerParams(
            dimension_semantics=("parallel",),
            vmem_limit_bytes=limit),
    )(*args)


# -----------------------------------------------------------------------------
# Glue: im2col (reshape/slice/concat only; all FLOPs live in the Pallas kernel)
# -----------------------------------------------------------------------------
def _im2col(x, stride, pad_val=None):
    """x: (N, H, W, C) -> (N*OH*OW, 16*C) bf16 patches (4x4 kernel, pad 1).

    pad_val (per-channel, optional) is the value whose fused BN+LeakyReLU in
    the consumer kernel maps to exactly 0, reproducing zero padding of the
    activated feature map."""
    N, H, W, C = x.shape
    xp = jnp.pad(x, ((0, 0), (1, 1), (1, 1), (0, 0)))
    if pad_val is not None:
        Hp, Wp = H + 2, W + 2
        ih = jnp.arange(Hp)[:, None]
        iw = jnp.arange(Wp)[None, :]
        border = (ih == 0) | (ih == Hp - 1) | (iw == 0) | (iw == Wp - 1)
        xp = jnp.where(border[None, :, :, None],
                       pad_val.astype(xp.dtype)[None, None, None, :], xp)
    OH = (H + 2 - 4) // stride + 1
    OW = (W + 2 - 4) // stride + 1
    cols = []
    for i in range(4):
        for j in range(4):
            cols.append(xp[:, i:i + stride * OH:stride,
                           j:j + stride * OW:stride, :])
    patches = jnp.concatenate(cols, axis=-1).astype(jnp.bfloat16)
    return patches.reshape(N * OH * OW, 16 * C), OH, OW


def _bn_scale_shift(stats, oc, m_valid, gamma, beta, eps=1e-5):
    """Reduce per-tile partials (tiny) and fold BN into a per-channel affine."""
    st = stats.reshape(-1, 8, stats.shape[-1])
    s = jnp.sum(st[:, 0, :oc], axis=0)
    ss = jnp.sum(st[:, 1, :oc], axis=0)
    mean = s / float(m_valid)
    # TODO(synk): E[x^2]-E[x]^2 in f32 can cancel if |mean| >> std.
    var = jnp.maximum(ss / float(m_valid) - mean * mean, 0.0)
    scale = gamma * lax.rsqrt(var + eps)
    shift = beta - mean * scale
    return scale, shift


# -----------------------------------------------------------------------------
# Parameters (mirrors NLayerDiscriminator.__init__ with norm_layer=BatchNorm2d)
# -----------------------------------------------------------------------------
def init_discriminator_params(key, input_nc, ndf, n_layers):
    kw = 4
    specs = [dict(cin=input_nc, cout=ndf, stride=2, kind="first")]
    nf_mult = 1
    nf_mult_prev = 1
    for n in range(1, n_layers):
        nf_mult_prev = nf_mult
        nf_mult = min(2 ** n, 8)
        specs.append(dict(cin=ndf * nf_mult_prev, cout=ndf * nf_mult,
                          stride=2, kind="bn"))
    nf_mult_prev = nf_mult
    nf_mult = min(2 ** n_layers, 8)
    specs.append(dict(cin=ndf * nf_mult_prev, cout=ndf * nf_mult,
                      stride=1, kind="bn"))
    specs.append(dict(cin=ndf * nf_mult, cout=1, stride=1, kind="final"))

    params = []
    for li, s in enumerate(specs):
        kkey = jax.random.fold_in(key, li)
        K = kw * kw * s["cin"]
        # PyTorch (OC, IC, KH, KW) -> im2col layout K=(kh, kw, ic) x OC.
        w_oihw = 0.05 * jax.random.normal(
            kkey, (s["cout"], s["cin"], kw, kw), dtype=jnp.float32)
        w2d = jnp.transpose(w_oihw, (2, 3, 1, 0)).reshape(K, s["cout"])
        p = dict(kind=s["kind"], stride=s["stride"], cout=s["cout"])
        if s["kind"] == "final":
            bkey = jax.random.fold_in(kkey, 1)
            p["w_row"] = jnp.transpose(w2d, (1, 0)).astype(jnp.float32)  # (1,K)
            p["b"] = 0.05 * jax.random.normal(bkey, (1, 1), jnp.float32)
        else:
            ocp = _round_up(s["cout"], 128)          # lane-dense MXU/store tiles
            p["w"] = _pad_cols(w2d, ocp).astype(jnp.bfloat16)            # (K,OCp)
            if s["kind"] == "first":
                bkey = jax.random.fold_in(kkey, 1)
                b = 0.05 * jax.random.normal(bkey, (1, s["cout"]), jnp.float32)
                p["b"] = _pad_cols(b, ocp)
            else:
                p["gamma"] = jnp.ones((s["cout"],), jnp.float32)
                p["beta"] = jnp.zeros((s["cout"],), jnp.float32)
        params.append(p)
    return params


# -----------------------------------------------------------------------------
# Forward pass (mirrors NLayerDiscriminator.forward, getIntermFeat=False)
# -----------------------------------------------------------------------------
def nlayer_discriminator_forward(x, params, patch_size):
    """x: (N, L, C) with L == patch_size**2.  Returns NCHW final feature map."""
    N, L, C = x.shape
    assert L == patch_size * patch_size
    # (N, L, C) is already channel-last: reshape straight to NHWC.
    h = x.reshape(N, patch_size, patch_size, C)

    pending = None   # (scale, shift) of a not-yet-applied BatchNorm+LeakyReLU
    for p in params:
        if pending is not None:
            scale, shift = pending
            pad_val = -shift / scale
            scale_k = jnp.tile(scale, 16)[None, :]   # per-channel -> per-K (taps)
            shift_k = jnp.tile(shift, 16)[None, :]
        else:
            pad_val = scale_k = shift_k = None

        patches, OH, OW = _im2col(h, p["stride"], pad_val)
        M = patches.shape[0]

        if p["kind"] == "bn":
            y, stats = conv_pallas(patches, p["w"], scale_k=scale_k,
                                   shift_k=shift_k, act=False,
                                   compute_stats=True, out_dtype=jnp.bfloat16)
            pending = _bn_scale_shift(stats, p["cout"], M, p["gamma"], p["beta"])
            h = y[:, :p["cout"]].reshape(N, OH, OW, p["cout"])
        elif p["kind"] == "final":
            y = conv_pallas(patches, p["w_row"], bias=p["b"], scale_k=scale_k,
                            shift_k=shift_k, act=False, compute_stats=False,
                            out_dtype=jnp.float32, final_reduce=True)
            pending = None
            h = y.reshape(N, OH, OW, 1)
        else:   # "first": conv + bias + LeakyReLU fused
            y = conv_pallas(patches, p["w"], bias=p["b"], scale_k=scale_k,
                            shift_k=shift_k, act=True, compute_stats=False,
                            out_dtype=jnp.bfloat16)
            pending = None
            h = y[:, :p["cout"]].reshape(N, OH, OW, p["cout"])

    # TODO(synk): BatchNorm running-stat updates (training-mode side effect)
    # are not replicated; only the forward output is reproduced.
    return jnp.transpose(h, (0, 3, 1, 2))            # NCHW (tiny final map)


# -----------------------------------------------------------------------------
# Demo
# -----------------------------------------------------------------------------
if __name__ == "__main__":
    patch_size = 16
    input_nc = 4
    ndf = 8
    n_layers = 2          # keeps spatial dims valid for kw=4 convs
    N = 2

    key = jax.random.PRNGKey(0)
    xkey, pkey = jax.random.split(key)
    # Input matches forward(): (N, L, C) with L = patch_size**2
    x = jax.random.normal(xkey, (N, patch_size * patch_size, input_nc),
                          dtype=jnp.float32)

    params = init_discriminator_params(pkey, input_nc, ndf, n_layers)

    fwd = functools.partial(nlayer_discriminator_forward,
                            params=params, patch_size=patch_size)
    out = jax.block_until_ready(jax.jit(fwd)(x))

    # Final PatchGAN map: (N, 1, 2, 2) for patch_size=16, n_layers=2
    assert out.shape == (N, 1, 2, 2), out.shape
    assert bool(jnp.all(jnp.isfinite(out)))
    print("KERNEL_OK")
</pallas_src>

<mosaic_0001>
module attributes {stable_mosaic.version = 11 : i64} {
  func.func @kernel(%arg0: i32, %arg1: memref<128x64xbf16, #tpu.memory_space<vmem>>, %arg2: memref<64x128xbf16, #tpu.memory_space<vmem>>, %arg3: memref<1x128xf32, #tpu.memory_space<vmem>>, %arg4: memref<128x128xbf16, #tpu.memory_space<vmem>>) attributes {dimension_semantics = [#tpu.dimension_semantics<parallel>], iteration_bounds = array<i64: 1>, scalar_prefetch = 0 : i64, scratch_operands = 0 : i64, tpu.core_type = #tpu.core_type<tc>, window_params = [{transform_indices = @transform_0, window_bounds = array<i64: 128, 64>}, {pipeline_mode = #tpu.pipeline_mode<synchronous>, transform_indices = @transform_1, window_bounds = array<i64: 64, 128>}, {pipeline_mode = #tpu.pipeline_mode<synchronous>, transform_indices = @transform_2, window_bounds = array<i64: 1, 128>}, {transform_indices = @transform_3, window_bounds = array<i64: 128, 128>}]} {
    %c0 = arith.constant 0 : index
    %c0_0 = arith.constant 0 : index
    %0 = vector.load %arg1[%c0, %c0_0] : memref<128x64xbf16, #tpu.memory_space<vmem>>, vector<128x64xbf16>
    %c0_1 = arith.constant 0 : index
    %c0_2 = arith.constant 0 : index
    %1 = vector.load %arg2[%c0_1, %c0_2] : memref<64x128xbf16, #tpu.memory_space<vmem>>, vector<64x128xbf16>
    %cst = arith.constant dense<0.000000e+00> : vector<128x128xf32>
    %2 = tpu.matmul %0, %1, %cst {dimension_numbers = #tpu.dot_dimension_numbers<[1], [0], [0], [1], [0, 0, 1, 1], [], []>} : vector<128x64xbf16>, vector<64x128xbf16>, vector<128x128xf32> -> vector<128x128xf32>
    %c0_3 = arith.constant 0 : index
    %c0_4 = arith.constant 0 : index
    %3 = vector.load %arg3[%c0_3, %c0_4] : memref<1x128xf32, #tpu.memory_space<vmem>>, vector<1x128xf32>
    %4 = vector.broadcast %3 : vector<1x128xf32> to vector<128x128xf32>
    %5 = arith.addf %2, %4 : vector<128x128xf32>
    %cst_5 = arith.constant 0.000000e+00 : f32
    %6 = vector.broadcast %cst_5 : f32 to vector<128x128xf32>
    %7 = arith.cmpf oge, %5, %6 : vector<128x128xf32>
    %cst_6 = arith.constant 2.000000e-01 : f32
    %8 = vector.broadcast %cst_6 : f32 to vector<128x128xf32>
    %9 = arith.mulf %8, %5 : vector<128x128xf32>
    %10 = arith.select %7, %5, %9 : vector<128x128xi1>, vector<128x128xf32>
    %11 = arith.truncf %10 : vector<128x128xf32> to vector<128x128xbf16>
    %c0_7 = arith.constant 0 : index
    %c0_8 = arith.constant 0 : index
    %12 = vector.load %arg4[%c0_7, %c0_8] : memref<128x128xbf16, #tpu.memory_space<vmem>>, vector<128x128xbf16>
    tpu.vector_store %arg4[%c0_7, %c0_8], %11 {strides = array<i32>} : memref<128x128xbf16, #tpu.memory_space<vmem>>, vector<128x128xbf16>,
    return
  }
  func.func @transform_0(%arg0: i32) -> (i32, i32) {
    %c0_i32 = arith.constant 0 : i32
    %c0_i32_0 = arith.constant 0 : i32
    return %arg0, %c0_i32 : i32, i32
  }
  func.func @transform_1(%arg0: i32) -> (i32, i32) {
    %c0_i32 = arith.constant 0 : i32
    %c0_i32_0 = arith.constant 0 : i32
    %c0_i32_1 = arith.constant 0 : i32
    return %c0_i32, %c0_i32_0 : i32, i32
  }
  func.func @transform_2(%arg0: i32) -> (i32, i32) {
    %c0_i32 = arith.constant 0 : i32
    %c0_i32_0 = arith.constant 0 : i32
    %c0_i32_1 = arith.constant 0 : i32
    return %c0_i32, %c0_i32_0 : i32, i32
  }
  func.func @transform_3(%arg0: i32) -> (i32, i32) {
    %c0_i32 = arith.constant 0 : i32
    %c0_i32_0 = arith.constant 0 : i32
    return %arg0, %c0_i32 : i32, i32
  }
}

module attributes {stable_mosaic.version = 11 : i64} {
  func.func @kernel(%arg0: i32, %arg1: memref<32x128xbf16, #tpu.memory_space<vmem>>, %arg2: memref<128x128xbf16, #tpu.memory_space<vmem>>, %arg3: memref<32x128xbf16, #tpu.memory_space<vmem>>, %arg4: memref<8x128xf32, #tpu.memory_space<vmem>>) attributes {dimension_semantics = [#tpu.dimension_semantics<parallel>], iteration_bounds = array<i64: 1>, scalar_prefetch = 0 : i64, scratch_operands = 0 : i64, tpu.core_type = #tpu.core_type<tc>, window_params = [{transform_indices = @transform_0, window_bounds = array<i64: 32, 128>}, {pipeline_mode = #tpu.pipeline_mode<synchronous>, transform_indices = @transform_1, window_bounds = array<i64: 128, 128>}, {transform_indices = @transform_2, window_bounds = array<i64: 32, 128>}, {transform_indices = @transform_3, window_bounds = array<i64: 8, 128>}]} {
    %c0 = arith.constant 0 : index
    %c0_0 = arith.constant 0 : index
    %0 = vector.load %arg1[%c0, %c0_0] : memref<32x128xbf16, #tpu.memory_space<vmem>>, vector<32x128xbf16>
    %c0_1 = arith.constant 0 : index
    %c0_2 = arith.constant 0 : index
    %1 = vector.load %arg2[%c0_1, %c0_2] : memref<128x128xbf16, #tpu.memory_space<vmem>>, vector<128x128xbf16>
    %cst = arith.constant dense<0.000000e+00> : vector<32x128xf32>
    %2 = tpu.matmul %0, %1, %cst {dimension_numbers = #tpu.dot_dimension_numbers<[1], [0], [0], [1], [0, 0, 1, 1], [], []>} : vector<32x128xbf16>, vector<128x128xbf16>, vector<32x128xf32> -> vector<32x128xf32>
    %3 = arith.truncf %2 : vector<32x128xf32> to vector<32x128xbf16>
    %c0_3 = arith.constant 0 : index
    %c0_4 = arith.constant 0 : index
    %4 = vector.load %arg3[%c0_3, %c0_4] : memref<32x128xbf16, #tpu.memory_space<vmem>>, vector<32x128xbf16>
    tpu.vector_store %arg3[%c0_3, %c0_4], %3 {strides = array<i32>} : memref<32x128xbf16, #tpu.memory_space<vmem>>, vector<32x128xbf16>,
    %5 = tpu.iota {dimensions = array<i32: 0>} : vector<32x1xi32>
    %c32_i32 = arith.constant 32 : i32
    %6 = arith.muli %arg0, %c32_i32 : i32
    %7 = vector.broadcast %6 : i32 to vector<32x1xi32>
    %8 = arith.addi %5, %7 : vector<32x1xi32>
    %c32_i32_5 = arith.constant 32 : i32
    %9 = vector.broadcast %c32_i32_5 : i32 to vector<32x1xi32>
    %10 = arith.cmpi slt, %8, %9 : vector<32x1xi32>
    %cst_6 = arith.constant 0.000000e+00 : f32
    %11 = vector.shape_cast %10 : vector<32x1xi1> to vector<32x1xi1>
    %12 = vector.broadcast %11 : vector<32x1xi1> to vector<32x128xi1>
    %13 = vector.broadcast %cst_6 : f32 to vector<32x128xf32>
    %14 = arith.select %12, %2, %13 : vector<32x128xi1>, vector<32x128xf32>
    %cst_7 = arith.constant dense<0.000000e+00> : vector<128xf32>
    %15 = vector.multi_reduction <add>, %14, %cst_7 [0] : vector<32x128xf32> to vector<128xf32>
    %16 = vector.shape_cast %15 : vector<128xf32> to vector<1x128xf32>
    %17 = arith.mulf %14, %14 : vector<32x128xf32>
    %cst_8 = arith.constant dense<0.000000e+00> : vector<128xf32>
    %18 = vector.multi_reduction <add>, %17, %cst_8 [0] : vector<32x128xf32> to vector<128xf32>
    %19 = vector.shape_cast %18 : vector<128xf32> to vector<1x128xf32>
    %cst_9 = arith.constant 0.000000e+00 : f32
    %20 = vector.broadcast %cst_9 : f32 to vector<6x128xf32>
    %21 = tpu.concatenate %16, %19, %20 in 0 : vector<1x128xf32>, vector<1x128xf32>, vector<6x128xf32> -> vector<8x128xf32>
    %c0_10 = arith.constant 0 : index
    %c0_11 = arith.constant 0 : index
    %22 = vector.load %arg4[%c0_10, %c0_11] : memref<8x128xf32, #tpu.memory_space<vmem>>, vector<8x128xf32>
    tpu.vector_store %arg4[%c0_10, %c0_11], %21 {strides = array<i32>} : memref<8x128xf32, #tpu.memory_space<vmem>>, vector<8x128xf32>,
    return
  }
  func.func @transform_0(%arg0: i32) -> (i32, i32) {
    %c0_i32 = arith.constant 0 : i32
    %c0_i32_0 = arith.constant 0 : i32
    return %arg0, %c0_i32 : i32, i32
  }
  func.func @transform_1(%arg0: i32) -> (i32, i32) {
    %c0_i32 = arith.constant 0 : i32
    %c0_i32_0 = arith.constant 0 : i32
    %c0_i32_1 = arith.constant 0 : i32
    return %c0_i32, %c0_i32_0 : i32, i32
  }
  func.func @transform_2(%arg0: i32) -> (i32, i32) {
    %c0_i32 = arith.constant 0 : i32
    %c0_i32_0 = arith.constant 0 : i32
    return %arg0, %c0_i32 : i32, i32
  }
  func.func @transform_3(%arg0: i32) -> (i32, i32) {
    %c0_i32 = arith.constant 0 : i32
    %c0_i32_0 = arith.constant 0 : i32
    return %arg0, %c0_i32 : i32, i32
  }
}

module attributes {stable_mosaic.version = 11 : i64} {
  func.func @kernel(%arg0: i32, %arg1: memref<32x256xbf16, #tpu.memory_space<vmem>>, %arg2: memref<1x256xf32, #tpu.memory_space<vmem>>, %arg3: memref<1x256xf32, #tpu.memory_space<vmem>>, %arg4: memref<256x128xbf16, #tpu.memory_space<vmem>>, %arg5: memref<32x128xbf16, #tpu.memory_space<vmem>>, %arg6: memref<8x128xf32, #tpu.memory_space<vmem>>) attributes {dimension_semantics = [#tpu.dimension_semantics<parallel>], iteration_bounds = array<i64: 1>, scalar_prefetch = 0 : i64, scratch_operands = 0 : i64, tpu.core_type = #tpu.core_type<tc>, window_params = [{transform_indices = @transform_0, window_bounds = array<i64: 32, 256>}, {pipeline_mode = #tpu.pipeline_mode<synchronous>, transform_indices = @transform_1, window_bounds = array<i64: 1, 256>}, {pipeline_mode = #tpu.pipeline_mode<synchronous>, transform_indices = @transform_2, window_bounds = array<i64: 1, 256>}, {pipeline_mode = #tpu.pipeline_mode<synchronous>, transform_indices = @transform_3, window_bounds = array<i64: 256, 128>}, {transform_indices = @transform_4, window_bounds = array<i64: 32, 128>}, {transform_indices = @transform_5, window_bounds = array<i64: 8, 128>}]} {
    %c0 = arith.constant 0 : index
    %c0_0 = arith.constant 0 : index
    %0 = vector.load %arg1[%c0, %c0_0] : memref<32x256xbf16, #tpu.memory_space<vmem>>, vector<32x256xbf16>
    %1 = arith.extf %0 : vector<32x256xbf16> to vector<32x256xf32>
    %c0_1 = arith.constant 0 : index
    %c0_2 = arith.constant 0 : index
    %2 = vector.load %arg2[%c0_1, %c0_2] : memref<1x256xf32, #tpu.memory_space<vmem>>, vector<1x256xf32>
    %3 = vector.broadcast %2 : vector<1x256xf32> to vector<32x256xf32>
    %4 = arith.mulf %1, %3 : vector<32x256xf32>
    %c0_3 = arith.constant 0 : index
    %c0_4 = arith.constant 0 : index
    %5 = vector.load %arg3[%c0_3, %c0_4] : memref<1x256xf32, #tpu.memory_space<vmem>>, vector<1x256xf32>
    %6 = vector.broadcast %5 : vector<1x256xf32> to vector<32x256xf32>
    %7 = arith.addf %4, %6 : vector<32x256xf32>
    %cst = arith.constant 0.000000e+00 : f32
    %8 = vector.broadcast %cst : f32 to vector<32x256xf32>
    %9 = arith.cmpf oge, %7, %8 : vector<32x256xf32>
    %cst_5 = arith.constant 2.000000e-01 : f32
    %10 = vector.broadcast %cst_5 : f32 to vector<32x256xf32>
    %11 = arith.mulf %10, %7 : vector<32x256xf32>
    %12 = arith.select %9, %7, %11 : vector<32x256xi1>, vector<32x256xf32>
    %13 = arith.truncf %12 : vector<32x256xf32> to vector<32x256xbf16>
    %c0_6 = arith.constant 0 : index
    %c0_7 = arith.constant 0 : index
    %14 = vector.load %arg4[%c0_6, %c0_7] : memref<256x128xbf16, #tpu.memory_space<vmem>>, vector<256x128xbf16>
    %cst_8 = arith.constant dense<0.000000e+00> : vector<32x128xf32>
    %15 = tpu.matmul %13, %14, %cst_8 {dimension_numbers = #tpu.dot_dimension_numbers<[1], [0], [0], [1], [0, 0, 1, 1], [], []>} : vector<32x256xbf16>, vector<256x128xbf16>, vector<32x128xf32> -> vector<32x128xf32>
    %16 = arith.truncf %15 : vector<32x128xf32> to vector<32x128xbf16>
    %c0_9 = arith.constant 0 : index
    %c0_10 = arith.constant 0 : index
    %17 = vector.load %arg5[%c0_9, %c0_10] : memref<32x128xbf16, #tpu.memory_space<vmem>>, vector<32x128xbf16>
    tpu.vector_store %arg5[%c0_9, %c0_10], %16 {strides = array<i32>} : memref<32x128xbf16, #tpu.memory_space<vmem>>, vector<32x128xbf16>,
    %18 = tpu.iota {dimensions = array<i32: 0>} : vector<32x1xi32>
    %c32_i32 = arith.constant 32 : i32
    %19 = arith.muli %arg0, %c32_i32 : i32
    %20 = vector.broadcast %19 : i32 to vector<32x1xi32>
    %21 = arith.addi %18, %20 : vector<32x1xi32>
    %c18_i32 = arith.constant 18 : i32
    %22 = vector.broadcast %c18_i32 : i32 to vector<32x1xi32>
    %23 = arith.cmpi slt, %21, %22 : vector<32x1xi32>
    %cst_11 = arith.constant 0.000000e+00 : f32
    %24 = vector.shape_cast %23 : vector<32x1xi1> to vector<32x1xi1>
    %25 = vector.broadcast %24 : vector<32x1xi1> to vector<32x128xi1>
    %26 = vector.broadcast %cst_11 : f32 to vector<32x128xf32>
    %27 = arith.select %25, %15, %26 : vector<32x128xi1>, vector<32x128xf32>
    %cst_12 = arith.constant dense<0.000000e+00> : vector<128xf32>
    %28 = vector.multi_reduction <add>, %27, %cst_12 [0] : vector<32x128xf32> to vector<128xf32>
    %29 = vector.shape_cast %28 : vector<128xf32> to vector<1x128xf32>
    %30 = arith.mulf %27, %27 : vector<32x128xf32>
    %cst_13 = arith.constant dense<0.000000e+00> : vector<128xf32>
    %31 = vector.multi_reduction <add>, %30, %cst_13 [0] : vector<32x128xf32> to vector<128xf32>
    %32 = vector.shape_cast %31 : vector<128xf32> to vector<1x128xf32>
    %cst_14 = arith.constant 0.000000e+00 : f32
    %33 = vector.broadcast %cst_14 : f32 to vector<6x128xf32>
    %34 = tpu.concatenate %29, %32, %33 in 0 : vector<1x128xf32>, vector<1x128xf32>, vector<6x128xf32> -> vector<8x128xf32>
    %c0_15 = arith.constant 0 : index
    %c0_16 = arith.constant 0 : index
    %35 = vector.load %arg6[%c0_15, %c0_16] : memref<8x128xf32, #tpu.memory_space<vmem>>, vector<8x128xf32>
    tpu.vector_store %arg6[%c0_15, %c0_16], %34 {strides = array<i32>} : memref<8x128xf32, #tpu.memory_space<vmem>>, vector<8x128xf32>,
    return
  }
  func.func @transform_0(%arg0: i32) -> (i32, i32) {
    %c0_i32 = arith.constant 0 : i32
    %c0_i32_0 = arith.constant 0 : i32
    return %arg0, %c0_i32 : i32, i32
  }
  func.func @transform_1(%arg0: i32) -> (i32, i32) {
    %c0_i32 = arith.constant 0 : i32
    %c0_i32_0 = arith.constant 0 : i32
    %c0_i32_1 = arith.constant 0 : i32
    return %c0_i32, %c0_i32_0 : i32, i32
  }
  func.func @transform_2(%arg0: i32) -> (i32, i32) {
    %c0_i32 = arith.constant 0 : i32
    %c0_i32_0 = arith.constant 0 : i32
    %c0_i32_1 = arith.constant 0 : i32
    return %c0_i32, %c0_i32_0 : i32, i32
  }
  func.func @transform_3(%arg0: i32) -> (i32, i32) {
    %c0_i32 = arith.constant 0 : i32
    %c0_i32_0 = arith.constant 0 : i32
    %c0_i32_1 = arith.constant 0 : i32
    return %c0_i32, %c0_i32_0 : i32, i32
  }
  func.func @transform_4(%arg0: i32) -> (i32, i32) {
    %c0_i32 = arith.constant 0 : i32
    %c0_i32_0 = arith.constant 0 : i32
    return %arg0, %c0_i32 : i32, i32
  }
  func.func @transform_5(%arg0: i32) -> (i32, i32) {
    %c0_i32 = arith.constant 0 : i32
    %c0_i32_0 = arith.constant 0 : i32
    return %arg0, %c0_i32 : i32, i32
  }
}

module attributes {stable_mosaic.version = 11 : i64} {
  func.func @kernel(%arg0: i32, %arg1: memref<16x512xbf16, #tpu.memory_space<vmem>>, %arg2: memref<1x512xf32, #tpu.memory_space<vmem>>, %arg3: memref<1x512xf32, #tpu.memory_space<vmem>>, %arg4: memref<1x512xf32, #tpu.memory_space<vmem>>, %arg5: memref<1x1xf32, #tpu.memory_space<vmem>>, %arg6: memref<16x1xf32, #tpu.memory_space<vmem>>) attributes {dimension_semantics = [#tpu.dimension_semantics<parallel>], iteration_bounds = array<i64: 1>, scalar_prefetch = 0 : i64, scratch_operands = 0 : i64, tpu.core_type = #tpu.core_type<tc>, window_params = [{transform_indices = @transform_0, window_bounds = array<i64: 16, 512>}, {pipeline_mode = #tpu.pipeline_mode<synchronous>, transform_indices = @transform_1, window_bounds = array<i64: 1, 512>}, {pipeline_mode = #tpu.pipeline_mode<synchronous>, transform_indices = @transform_2, window_bounds = array<i64: 1, 512>}, {pipeline_mode = #tpu.pipeline_mode<synchronous>, transform_indices = @transform_3, window_bounds = array<i64: 1, 512>}, {pipeline_mode = #tpu.pipeline_mode<synchronous>, transform_indices = @transform_4, window_bounds = array<i64: 1, 1>}, {transform_indices = @transform_5, window_bounds = array<i64: 16, 1>}]} {
    %c0 = arith.constant 0 : index
    %c0_0 = arith.constant 0 : index
    %0 = vector.load %arg1[%c0, %c0_0] : memref<16x512xbf16, #tpu.memory_space<vmem>>, vector<16x512xbf16>
    %1 = arith.extf %0 : vector<16x512xbf16> to vector<16x512xf32>
    %c0_1 = arith.constant 0 : index
    %c0_2 = arith.constant 0 : index
    %2 = vector.load %arg2[%c0_1, %c0_2] : memref<1x512xf32, #tpu.memory_space<vmem>>, vector<1x512xf32>
    %3 = vector.broadcast %2 : vector<1x512xf32> to vector<16x512xf32>
    %4 = arith.mulf %1, %3 : vector<16x512xf32>
    %c0_3 = arith.constant 0 : index
    %c0_4 = arith.constant 0 : index
    %5 = vector.load %arg3[%c0_3, %c0_4] : memref<1x512xf32, #tpu.memory_space<vmem>>, vector<1x512xf32>
    %6 = vector.broadcast %5 : vector<1x512xf32> to vector<16x512xf32>
    %7 = arith.addf %4, %6 : vector<16x512xf32>
    %cst = arith.constant 0.000000e+00 : f32
    %8 = vector.broadcast %cst : f32 to vector<16x512xf32>
    %9 = arith.cmpf oge, %7, %8 : vector<16x512xf32>
    %cst_5 = arith.constant 2.000000e-01 : f32
    %10 = vector.broadcast %cst_5 : f32 to vector<16x512xf32>
    %11 = arith.mulf %10, %7 : vector<16x512xf32>
    %12 = arith.select %9, %7, %11 : vector<16x512xi1>, vector<16x512xf32>
    %c0_6 = arith.constant 0 : index
    %c0_7 = arith.constant 0 : index
    %13 = vector.load %arg4[%c0_6, %c0_7] : memref<1x512xf32, #tpu.memory_space<vmem>>, vector<1x512xf32>
    %14 = vector.broadcast %13 : vector<1x512xf32> to vector<16x512xf32>
    %15 = arith.mulf %12, %14 : vector<16x512xf32>
    %cst_8 = arith.constant dense<0.000000e+00> : vector<16xf32>
    %16 = vector.multi_reduction <add>, %15, %cst_8 [1] : vector<16x512xf32> to vector<16xf32>
    %17 = vector.shape_cast %16 : vector<16xf32> to vector<16x1xf32>
    %c0_9 = arith.constant 0 : index
    %c0_10 = arith.constant 0 : index
    %18 = vector.load %arg5[%c0_9, %c0_10] : memref<1x1xf32, #tpu.memory_space<vmem>>, vector<1x1xf32>
    %19 = vector.broadcast %18 : vector<1x1xf32> to vector<16x1xf32>
    %20 = arith.addf %17, %19 : vector<16x1xf32>
    %c0_11 = arith.constant 0 : index
    %c0_12 = arith.constant 0 : index
    %21 = vector.load %arg6[%c0_11, %c0_12] : memref<16x1xf32, #tpu.memory_space<vmem>>, vector<16x1xf32>
    tpu.vector_store %arg6[%c0_11, %c0_12], %20 {strides = array<i32>} : memref<16x1xf32, #tpu.memory_space<vmem>>, vector<16x1xf32>,
    return
  }
  func.func @transform_0(%arg0: i32) -> (i32, i32) {
    %c0_i32 = arith.constant 0 : i32
    %c0_i32_0 = arith.constant 0 : i32
    return %arg0, %c0_i32 : i32, i32
  }
  func.func @transform_1(%arg0: i32) -> (i32, i32) {
    %c0_i32 = arith.constant 0 : i32
    %c0_i32_0 = arith.constant 0 : i32
    %c0_i32_1 = arith.constant 0 : i32
    return %c0_i32, %c0_i32_0 : i32, i32
  }
  func.func @transform_2(%arg0: i32) -> (i32, i32) {
    %c0_i32 = arith.constant 0 : i32
    %c0_i32_0 = arith.constant 0 : i32
    %c0_i32_1 = arith.constant 0 : i32
    return %c0_i32, %c0_i32_0 : i32, i32
  }
  func.func @transform_3(%arg0: i32) -> (i32, i32) {
    %c0_i32 = arith.constant 0 : i32
    %c0_i32_0 = arith.constant 0 : i32
    %c0_i32_1 = arith.constant 0 : i32
    return %c0_i32, %c0_i32_0 : i32, i32
  }
  func.func @transform_4(%arg0: i32) -> (i32, i32) {
    %c0_i32 = arith.constant 0 : i32
    %c0_i32_0 = arith.constant 0 : i32
    %c0_i32_1 = arith.constant 0 : i32
    return %c0_i32, %c0_i32_0 : i32, i32
  }
  func.func @transform_5(%arg0: i32) -> (i32, i32) {
    %c0_i32 = arith.constant 0 : i32
    %c0_i32_0 = arith.constant 0 : i32
    return %arg0, %c0_i32 : i32, i32
  }
}

</mosaic_0001>

<bundles_post_ra>
// kernel: nlayer_discriminator_forward.4
= control target key start
LH: loop header
LB: loop body
LE: loop exit
PB: predicated region body
PF: predicated region fallthrough
CT: control target
= control target key end

     0   :  { %vm110_vm0 = vcmask 523264   ;;  %s635_s1 = inlined_call_operand.vmem [shape: bf16[64,128], index: 1, kind: input, shape index: {}]   ;;  %s636_s0 = inlined_call_operand.vmem [shape: bf16[128,64], index: 0, kind: input, shape index: {}]   ;;  %s637_s2 = inlined_call_operand.vmem [shape: f32[1,128], index: 2, kind: input, shape index: {}]   ;;  %s638_s3 = inlined_call_operand.vmem [shape: bf16[128,128], index: 3, kind: output, shape index: {}]  }
   0x1   :  { %v508_v0 = vld [vmem:[%s635_s1 + $0x18] sm:$0xff]   ;;  %v509_v1 = vld [vmem:[%s635_s1 + $0x10] sm:$0xff]   ;;  %v510_v2 = vld [vmem:[%s635_s1 + $0x8] sm:$0xff]  }
   0x2   :  { %476 = vmatprep.subr.bf16.mxu0 %v508_v0  ;;  %500 = vmatprep.subr.bf16.mxu1 %v508_v0  ;;  %v512_v3 = vld [vmem:[%s636_s0] sm:$0xff]   ;;  %v514_v6 = vld [vmem:[%s636_s0 + $0x8] sm:$0xff]   ;;  %v516_v8 = vld [vmem:[%s636_s0 + $0x10] sm:$0xff]  }
   0x3   :  { %477 = vmatpush3.bf16.msra.mxu0 %v508_v0  ;;  %504 = vmatpush3.bf16.msra.mxu1 %v508_v0  ;;  %v513_v4 = vld [vmem:[%s636_s0 + $0x20] sm:$0xff]   ;;  %v515_v7 = vld [vmem:[%s636_s0 + $0x28] sm:$0xff]   ;;  %v517_v9 = vld [vmem:[%s636_s0 + $0x30] sm:$0xff]  }
   0x4   :  { %478 = vmatprep.subr.bf16.mxu0 %v509_v1  ;;  %501 = vmatprep.subr.bf16.mxu1 %v509_v1  ;;  %v511_v5 = vld [vmem:[%s635_s1] sm:$0xff]   ;;  %v518_v10 = vld [vmem:[%s636_s0 + $0x18] sm:$0xff]  }
   0x5   :  { %484 = vmatprep.mubr.msk.bf16.mxu0 %vm110_vm0, %v512_v3  ;;  %492 = vmatprep.mubr.msk.bf16.mxu1 %vm110_vm0, %v513_v4  ;;  %v519_v11 = vld [vmem:[%s636_s0 + $0x38] sm:$0xff]   ;;  %v587_v12 = vld [vmem:[%s637_s2] ss:$0 sm:$0xff] }
   0x7   :  { %479 = vmatpush3.bf16.msra.mxu0 %v509_v1  ;;  %505 = vmatpush3.bf16.msra.mxu1 %v509_v1 }
   0x8   :  { %480 = vmatprep.subr.bf16.mxu0 %v510_v2  ;;  %502 = vmatprep.subr.bf16.mxu1 %v510_v2 }
   0xb   :  { %481 = vmatpush3.bf16.msra.mxu0 %v510_v2  ;;  %506 = vmatpush3.bf16.msra.mxu1 %v510_v2 }
   0xc   :  { %482 = vmatprep.subr.bf16.mxu0 %v511_v5  ;;  %503 = vmatprep.subr.bf16.mxu1 %v511_v5 }
   0xf   :  { %483 = vmatpush3.bf16.msra.mxu0 %v511_v5  ;;  %507 = vmatpush3.bf16.msra.mxu1 %v511_v5 }
  0x12   :  { %485 = vmatmul.mubr.msk.bf16.vlgmr.msra.gmra.mxu0 %vm110_vm0, %v514_v6  ;;  %493 = vmatmul.mubr.msk.bf16.vlgmr.msra.gmra.mxu1 %vm110_vm0, %v515_v7 }
  0x13   :  { %488 = vmatprep.mubr.msk.bf16.mxu0 %vm110_vm0, %v516_v8  ;;  %496 = vmatprep.mubr.msk.bf16.mxu1 %vm110_vm0, %v517_v9 }
  0x1a   :  { %489 = vmatmul.mubr.msk.bf16.gmra.mxu0 %vm110_vm0, %v518_v10  ;;  %497 = vmatmul.mubr.msk.bf16.gmra.mxu1 %vm110_vm0, %v519_v11 }
  0xd2   :  { %v486_v13 = vpop.f32.mrf.mxu0  ;;  %v494_v14 = vpop.f32.mrf.mxu1 }
  0xd3   :  { %v178_v15 = vadd.f32 %v486_v13, %v587_v12  ;;  %v210_v16 = vadd.f32 %v494_v14, %v587_v12 }
  0xd4   :  { %v169_v17 = vpop.f32.mrf.mxu0  ;;  %v201_v18 = vpop.f32.mrf.mxu1 }
  0xd5   :  { %vm234_vm1 = vcmp.ge.f32.partialorder %v178_v15, 0.0  ;;  %v250_v19 = vmul.f32 0.2, %v178_v15  ;;  %vm242_vm2 = vcmp.ge.f32.partialorder %v210_v16, 0.0  ;;  %v258_v20 = vmul.f32 0.2, %v210_v16 }
  0xd6   :  { %v170_v21 = vadd.f32 %v587_v12, %v169_v17  ;;  %v202_v22 = vadd.f32 %v587_v12, %v201_v18  ;;  %v487_v23 = vpop.f32.mrf.mxu0  ;;  %v495_v24 = vpop.f32.mrf.mxu1 }
  0xd7   :  { %v181_v25 = vadd.f32 %v487_v23, %v587_v12  ;;  %v213_v26 = vadd.f32 %v495_v24, %v587_v12  ;;  %v266_v27 = vsel %vm234_vm1, %v178_v15, %v250_v19  ;;  %v274_v28 = vsel %vm242_vm2, %v210_v16, %v258_v20 }
  0xd8   :  { %vm232_vm3 = vcmp.ge.f32.partialorder %v170_v21, 0.0  ;;  %v248_v29 = vmul.f32 0.2, %v170_v21  ;;  %v172_v30 = vpop.f32.mrf.mxu0  ;;  %v204_v31 = vpop.f32.mrf.mxu1  ;;  %vm240_vm6 = vcmp.ge.f32.partialorder %v202_v22, 0.0  ;;  %v256_v34 = vmul.f32 0.2, %v202_v22 }
  0xd9   :  { %vm235_vm4 = vcmp.ge.f32.partialorder %v181_v25, 0.0  ;;  %v251_v32 = vmul.f32 0.2, %v181_v25  ;;  %vm243_vm5 = vcmp.ge.f32.partialorder %v213_v26, 0.0  ;;  %v259_v33 = vmul.f32 0.2, %v213_v26 }
  0xda   :  { %v173_v35 = vadd.f32 %v587_v12, %v172_v30  ;;  %v205_v36 = vadd.f32 %v587_v12, %v204_v31  ;;  %v490_v37 = vpop.f32.mrf.mxu0  ;;  %v498_v38 = vpop.f32.mrf.mxu1  ;;  %v264_v49 = vsel %vm232_vm3, %v170_v21, %v248_v29  ;;  %v272_v54 = vsel %vm240_vm6, %v202_v22, %v256_v34 }
  0xdb   :  { %v267_v39 = vsel %vm235_vm4, %v181_v25, %v251_v32  ;;  %v275_v40 = vsel %vm243_vm5, %v213_v26, %v259_v33  ;;  %v194_v41 = vadd.f32 %v490_v37, %v587_v12  ;;  %v226_v42 = vadd.f32 %v498_v38, %v587_v12 }
  0xdc   :  { %v425_v43 = vpack.c.bf16 %v267_v39, %v266_v27  ;;  %v445_v44 = vpack.c.bf16 %v275_v40, %v274_v28  ;;  %vm233_vm7 = vcmp.ge.f32.partialorder %v173_v35, 0.0  ;;  %v249_v45 = vmul.f32 0.2, %v173_v35  ;;  %v185_v46 = vpop.f32.mrf.mxu0  ;;  %v217_v47 = vpop.f32.mrf.mxu1 }
  0xdd   :  { %vm241_vm8 = vcmp.ge.f32.partialorder %v205_v36, 0.0  ;;  %v257_v48 = vmul.f32 0.2, %v205_v36  ;;  %v186_v51 = vadd.f32 %v587_v12, %v185_v46  ;;  %v218_v57 = vadd.f32 %v587_v12, %v217_v47 }
  0xde   :  { %457 = vst [vmem:[%s638_s3 + $0x8] sm:$0xff] %v425_v43   ;;  %461 = vst [vmem:[%s638_s3 + $0x28] sm:$0xff] %v445_v44   ;;  %v265_v50 = vsel %vm233_vm7, %v173_v35, %v249_v45  ;;  %v491_v52 = vpop.f32.mrf.mxu0  ;;  %v499_v53 = vpop.f32.mrf.mxu1  ;;  %vm238_vm9 = vcmp.ge.f32.partialorder %v194_v41, 0.0  ;;  %v254_v59 = vmul.f32 0.2, %v194_v41  ;;  %vm246_vm10 = vcmp.ge.f32.partialorder %v226_v42, 0.0 }
  0xdf   :  { %v420_v55 = vpack.c.bf16 %v265_v50, %v264_v49  ;;  %v273_v56 = vsel %vm241_vm8, %v205_v36, %v257_v48  ;;  %v262_v62 = vmul.f32 0.2, %v226_v42  ;;  %vm236_vm11 = vcmp.ge.f32.partialorder %v186_v51, 0.0 }
  0xe0   :  { %v440_v58 = vpack.c.bf16 %v273_v56, %v272_v54  ;;  %v188_v60 = vpop.f32.mrf.mxu0  ;;  %v220_v61 = vpop.f32.mrf.mxu1  ;;  %v197_v63 = vadd.f32 %v491_v52, %v587_v12  ;;  %v229_v0 = vadd.f32 %v499_v53, %v587_v12  ;;  %v252_v1 = vmul.f32 0.2, %v186_v51 }
  0xe1   :  { %421 = vst [vmem:[%s638_s3] sm:$0xff] %v420_v55   ;;  %vm244_vm12 = vcmp.ge.f32.partialorder %v218_v57, 0.0  ;;  %v189_v2 = vadd.f32 %v587_v12, %v188_v60  ;;  %v221_v3 = vadd.f32 %v587_v12, %v220_v61  ;;  %v260_v4 = vmul.f32 0.2, %v218_v57 }
  0xe2   :  { %460 = vst [vmem:[%s638_s3 + $0x20] sm:$0xff] %v440_v58   ;;  %vm239_vm13 = vcmp.ge.f32.partialorder %v197_v63, 0.0  ;;  %v255_v5 = vmul.f32 0.2, %v197_v63  ;;  %vm247_vm14 = vcmp.ge.f32.partialorder %v229_v0, 0.0  ;;  %v270_v8 = vsel %vm238_vm9, %v194_v41, %v254_v59 }
  0xe3   :  { %v263_v6 = vmul.f32 0.2, %v229_v0  ;;  %vm237_vm15 = vcmp.ge.f32.partialorder %v189_v2, 0.0  ;;  %v253_v7 = vmul.f32 0.2, %v189_v2  ;;  %vm245_vm0 = vcmp.ge.f32.partialorder %v221_v3, 0.0 }
  0xe4   :  { %v278_v9 = vsel %vm246_vm10, %v226_v42, %v262_v62  ;;  %v271_v10 = vsel %vm239_vm13, %v197_v63, %v255_v5  ;;  %v261_v11 = vmul.f32 0.2, %v221_v3  ;;  %v268_v13 = vsel %vm236_vm11, %v186_v51, %v252_v1 }
  0xe5   :  { %v435_v14 = vpack.c.bf16 %v271_v10, %v270_v8  ;;  %v279_v15 = vsel %vm247_vm14, %v229_v0, %v263_v6  ;;  %v269_v16 = vsel %vm237_vm15, %v189_v2, %v253_v7  ;;  %v276_v12 = vsel %vm244_vm12, %v218_v57, %v260_v4 }
  0xe6   :  { %v455_v17 = vpack.c.bf16 %v279_v15, %v278_v9  ;;  %v430_v18 = vpack.c.bf16 %v269_v16, %v268_v13  ;;  %v277_v19 = vsel %vm245_vm0, %v221_v3, %v261_v11 }
  0xe7   :  { %459 = vst [vmem:[%s638_s3 + $0x18] sm:$0xff] %v435_v14   ;;  %v450_v20 = vpack.c.bf16 %v277_v19, %v276_v12 }
  0xe8   :  { %463 = vst [vmem:[%s638_s3 + $0x38] sm:$0xff] %v455_v17   ;;  %458 = vst [vmem:[%s638_s3 + $0x10] sm:$0xff] %v430_v18  }
  0xe9   :  { %462 = vst [vmem:[%s638_s3 + $0x30] sm:$0xff] %v450_v20  }

// kernel: tile.23
= control target key start
LH: loop header
LB: loop body
LE: loop exit
PB: predicated region body
PF: predicated region fallthrough
CT: control target
= control target key end

     0   :  { %s28_s0 = inlined_call_operand.vmem [shape: f32[16], index: 0, kind: input, shape index: {}]   ;;  %s29_s1 = inlined_call_operand.vmem [shape: f32[16,16], index: 1, kind: output, shape index: {}]  }
   0x1   :  { %v4_v0 = vld [vmem:[%s28_s0] ss:$0 sm:$0xff] }
   0x2   :  { %5 = vst [vmem:[%s29_s1] sm:$0xff] %v4_v0  ;;  %8 = vst [vmem:[%s29_s1 + $0x8] sm:$0xff] %v4_v0 }

// kernel: tile.24
= control target key start
LH: loop header
LB: loop body
LE: loop exit
PB: predicated region body
PF: predicated region fallthrough
CT: control target
= control target key end

     0   :  { %s7_s6 = smov 3  ;;  %s21_s9 = smov 3  ;;  %vm4_vm0 = vcmask 130048   ;;  %vm11_vm1 = vcmask 1048448   ;;  %vm18_vm2 = vcmask 917248   ;;  %vm25_vm3 = vcmask 786048   ;;  %s131_s0 = inlined_call_operand.vmem [shape: f32[16,16], index: 0, kind: input, shape index: {}]   ;;  %s132_s1 = inlined_call_operand.vmem [shape: f32[1,256], index: 1, kind: output, shape index: {}]  }
   0x1   :  { %v69_v0 = vld [vmem:[%s131_s0 + $0x7] ss:$8 sm:%s7_s6]   ;;  %s84_s10 = smov 112   ;;  %v71_v1 = vld [vmem:[%s131_s0 + $0x5] ss:$8 sm:%s21_s9]   ;;  %s14_s13 = smov 3 }
   0x2   :  { %9 = vrot.lane.b32.xlu0 %v69_v0, %s84_s10  ;;  %s85_s14 = smov 80   ;;  %v70_v2 = vld [vmem:[%s131_s0 + $0x6] ss:$8 sm:%s14_s13]   ;;  %s28_s17 = smov 3  ;;  %vm32_vm4 = vcmask 654848   ;;  %vm39_vm5 = vcmask 523648  }
   0x3   :  { %23 = vrot.lane.b32.xlu1 %v71_v1, %s85_s14  ;;  %v72_v3 = vld [vmem:[%s131_s0 + $0x4] ss:$8 sm:%s28_s17]   ;;  %s35_s20 = smov 3  ;;  %s42_s21 = smov 3  ;;  %vm46_vm6 = vcmask 392448   ;;  %vm53_vm7 = vcmask 261248  }
   0x4   :  { %s86_s22 = smov 96   ;;  %s87_s23 = smov 64   ;;  %v73_v4 = vld [vmem:[%s131_s0 + $0x3] ss:$8 sm:%s35_s20]   ;;  %v74_v5 = vld [vmem:[%s131_s0 + $0x2] ss:$8 sm:%s42_s21]  }
   0x5   :  { %s2_s26 = smov 3  ;;  %s49_s29 = smov 3 }
   0x6   :  { %16 = vrot.lane.b32.xlu0 %v70_v2, %s86_s22  ;;  %v3_v6 = vld [vmem:[%s131_s0] ss:$8 sm:%s2_s26]   ;;  %s88_s3 = smov 48   ;;  %s89_s4 = smov 32  }
   0x7   :  { %30 = vrot.lane.b32.xlu1 %v72_v3, %s87_s23  ;;  %5 = vst.msk [vmem:[#allocation0] ss:$8 sm:$0x3] %vm4_vm0, %v3_v6   ;;  %v75_v7 = vld [vmem:[%s131_s0 + $0x1] ss:$8 sm:%s49_s29]   ;;  %s90_s0 = smov 16  }
   0xa   :  { %37 = vrot.lane.b32.xlu0 %v73_v4, %s88_s3 }
   0xb   :  { %44 = vrot.lane.b32.xlu1 %v74_v5, %s89_s4 }
   0xe   :  { %51 = vrot.lane.b32.xlu0 %v75_v7, %s90_s0 }
  0x74   :  { %v10_v8 = vpop.permute.xlu0 %9  }
  0x75   :  { %12 = vst.msk [vmem:[#allocation0] ss:$8 sm:$0x3] %vm11_vm1, %v10_v8   ;;  %v24_v9 = vpop.permute.xlu1 %23  }
  0x78   :  { %v17_v10 = vpop.permute.xlu0 %16  }
  0x79   :  { %19 = vst.msk [vmem:[#allocation0] ss:$8 sm:$0x3] %vm18_vm2, %v17_v10   ;;  %v31_v11 = vpop.permute.xlu1 %30  }
  0x7a   :  { %26 = vst.msk [vmem:[#allocation0] ss:$8 sm:$0x3] %vm25_vm3, %v24_v9  }
  0x7b   :  { %33 = vst.msk [vmem:[#allocation0] ss:$8 sm:$0x3] %vm32_vm4, %v31_v11  }
  0x7c   :  { %v38_v12 = vpop.permute.xlu0 %37  }
  0x7d   :  { %40 = vst.msk [vmem:[#allocation0] ss:$8 sm:$0x3] %vm39_vm5, %v38_v12   ;;  %v45_v13 = vpop.permute.xlu1 %44  }
  0x7e   :  { %47 = vst.msk [vmem:[#allocation0] ss:$8 sm:$0x3] %vm46_vm6, %v45_v13  }
  0x80   :  { %v52_v14 = vpop.permute.xlu0 %51  }
  0x81   :  { %54 = vst.msk [vmem:[#allocation0] ss:$8 sm:$0x3] %vm53_vm7, %v52_v14  }
  0x88   :  { %v59_v15 = vld [vmem:[#allocation0] sm:$0x1]  ;;  %v64_v16 = vld [vmem:[#allocation0 + $0x8] sm:$0x1] }
  0x89   :  { %62 = vst [vmem:[%s132_s1] sm:$0x1] %v59_v15  ;;  %76 = vst [vmem:[%s132_s1 + $0x1] sm:$0x1] %v64_v16 }

// kernel: nlayer_discriminator_forward.5
= control target key start
LH: loop header
LB: loop body
LE: loop exit
PB: predicated region body
PF: predicated region fallthrough
CT: control target
= control target key end

     0   :  { %vm212_vm0 = vcmask 1040384   ;;  %vm214_vm1 = vcmask 1041408   ;;  %s353_s1 = inlined_call_operand.vmem [shape: bf16[128,128], index: 1, kind: input, shape index: {}]   ;;  %s354_s0 = inlined_call_operand.vmem [shape: bf16[32,128], index: 0, kind: input, shape index: {}]   ;;  %s355_s2 = inlined_call_operand.vmem [shape: bf16[32,128], index: 2, kind: output, shape index: {0}]   ;;  %s356_s3 = inlined_call_operand.vmem [shape: f32[8,128], index: 3, kind: output, shape index: {1}]  }
   0x1   :  { %v284_v0 = vld [vmem:[%s353_s1 + $0x38] sm:$0xff]   ;;  %v285_v1 = vld [vmem:[%s353_s1 + $0x30] sm:$0xff]   ;;  %v286_v2 = vld [vmem:[%s353_s1 + $0x28] sm:$0xff]  }
   0x2   :  { %264 = vmatprep.subr.bf16.mxu0 %v284_v0  ;;  %v287_v3 = vld [vmem:[%s353_s1 + $0x20] sm:$0xff]   ;;  %v288_v5 = vld [vmem:[%s353_s1 + $0x18] sm:$0xff]   ;;  %v289_v6 = vld [vmem:[%s353_s1 + $0x10] sm:$0xff]  }
   0x3   :  { %265 = vmatpush3.bf16.msra.mxu0 %v284_v0  ;;  %v292_v4 = vld [vmem:[%s354_s0] sm:$0xff]   ;;  %v290_v7 = vld [vmem:[%s353_s1 + $0x8] sm:$0xff]  }
   0x4   :  { %266 = vmatprep.subr.bf16.mxu0 %v285_v1  ;;  %280 = vmatprep.mubr.bf16.mxu0 %v292_v4  ;;  %v291_v8 = vld [vmem:[%s353_s1] sm:$0xff]   ;;  %v293_v9 = vld [vmem:[%s354_s0 + $0x8] sm:$0xff]  }
   0x7   :  { %267 = vmatpush3.bf16.msra.mxu0 %v285_v1 }
   0x8   :  { %268 = vmatprep.subr.bf16.mxu0 %v286_v2 }
   0xb   :  { %269 = vmatpush3.bf16.msra.mxu0 %v286_v2 }
   0xc   :  { %270 = vmatprep.subr.bf16.mxu0 %v287_v3 }
   0xf   :  { %271 = vmatpush3.bf16.msra.mxu0 %v287_v3 }
  0x10   :  { %272 = vmatprep.subr.bf16.mxu0 %v288_v5 }
  0x13   :  { %273 = vmatpush3.bf16.msra.mxu0 %v288_v5 }
  0x14   :  { %274 = vmatprep.subr.bf16.mxu0 %v289_v6 }
  0x17   :  { %275 = vmatpush3.bf16.msra.mxu0 %v289_v6 }
  0x18   :  { %276 = vmatprep.subr.bf16.mxu0 %v290_v7 }
  0x1b   :  { %277 = vmatpush3.bf16.msra.mxu0 %v290_v7 }
  0x1c   :  { %278 = vmatprep.subr.bf16.mxu0 %v291_v8 }
  0x1f   :  { %279 = vmatpush3.bf16.msra.mxu0 %v291_v8 }
  0x22   :  { %281 = vmatmul.mubr.bf16.vlgmr.msra.gmra.mxu0 %v293_v9 }
  0xe2   :  { %v282_v10 = vpop.f32.mrf.mxu0 }
  0xe3   :  { %v201_v19 = vmul.f32 %v282_v10, %v282_v10 }
  0xe4   :  { %v128_v11 = vpop.f32.mrf.mxu0 }
  0xe5   :  { %v199_v15 = vmul.f32 %v128_v11, %v128_v11 }
  0xe6   :  { %v283_v12 = vpop.f32.mrf.mxu0 }
  0xe7   :  { %v251_v13 = vpack.c.bf16 %v283_v12, %v282_v10  ;;  %v202_v22 = vmul.f32 %v283_v12, %v283_v12 }
  0xe8   :  { %v131_v14 = vpop.f32.mrf.mxu0 }
  0xe9   :  { %v246_v16 = vpack.c.bf16 %v131_v14, %v128_v11  ;;  %253 = vst [vmem:[%s355_s2 + $0x8] sm:$0xff] %v251_v13   ;;  %v190_v17 = vadd.f32 %v131_v14, %v128_v11  ;;  %v200_v18 = vmul.f32 %v131_v14, %v131_v14 }
  0xeb   :  { %247 = vst [vmem:[%s355_s2] sm:$0xff] %v246_v16   ;;  %v191_v20 = vadd.f32 %v282_v10, %v190_v17  ;;  %v203_v21 = vadd.f32 %v200_v18, %v199_v15 }
  0xed   :  { %v192_v23 = vadd.f32 %v283_v12, %v191_v20  ;;  %v204_v24 = vadd.f32 %v203_v21, %v201_v19 }
  0xef   :  { %v193_v25 = vrot.slane %v192_v23, 4  ;;  %v205_v26 = vadd.f32 %v204_v24, %v202_v22 }
  0xf1   :  { %v194_v27 = vadd.f32 %v193_v25, %v192_v23  ;;  %v206_v28 = vrot.slane %v205_v26, 4 }
  0xf3   :  { %v195_v29 = vrot.slane %v194_v27, 2  ;;  %v207_v30 = vadd.f32 %v206_v28, %v205_v26 }
  0xf5   :  { %v196_v31 = vadd.f32 %v195_v29, %v194_v27  ;;  %v208_v32 = vrot.slane %v207_v30, 2 }
  0xf7   :  { %v197_v33 = vrot.slane %v196_v31, 1  ;;  %v209_v34 = vadd.f32 %v208_v32, %v207_v30 }
  0xf9   :  { %v210_v35 = vrot.slane %v209_v34, 1  ;;  %v198_v36 = vadd.f32 %v197_v33, %v196_v31 }
  0xfb   :  { %v211_v37 = vadd.f32 %v210_v35, %v209_v34 }
  0xfd   :  { %v213_v38 = vsel %vm212_vm0, %v198_v36, %v211_v37 }
  0xfe   :  { %v215_v39 = vsel %vm214_vm1, %v213_v38, 0.0 }
  0xff   :  { %216 = vst [vmem:[%s356_s3] sm:$0xff] %v215_v39 }

// kernel: tile.33
= control target key start
LH: loop header
LB: loop body
LE: loop exit
PB: predicated region body
PF: predicated region fallthrough
CT: control target
= control target key end

     0   :  { %s28_s0 = inlined_call_operand.vmem [shape: f32[32], index: 0, kind: input, shape index: {}]   ;;  %s29_s1 = inlined_call_operand.vmem [shape: f32[16,32], index: 1, kind: output, shape index: {}]  }
   0x1   :  { %v4_v0 = vld [vmem:[%s28_s0] ss:$0 sm:$0xff] }
   0x2   :  { %5 = vst [vmem:[%s29_s1] sm:$0xff] %v4_v0  ;;  %8 = vst [vmem:[%s29_s1 + $0x8] sm:$0xff] %v4_v0 }

// kernel: tile.34
= control target key start
LH: loop header
LB: loop body
LE: loop exit
PB: predicated region body
PF: predicated region fallthrough
CT: control target
= control target key end

     0   :  { %s62_s8 = smov 96   ;;  %vm3_vm0 = vcmask 261120   ;;  %s64_s15 = smov 64   ;;  %vm9_vm1 = vcmask 1048320   ;;  %vm15_vm2 = vcmask 785920   ;;  %vm21_vm3 = vcmask 523520   ;;  %s99_s0 = inlined_call_operand.vmem [shape: f32[16,32], index: 0, kind: input, shape index: {}]   ;;  %s100_s1 = inlined_call_operand.vmem [shape: f32[1,512], index: 1, kind: output, shape index: {}]  }
   0x1   :  { %v53_v0 = vld [vmem:[%s99_s0 + $0x3] ss:$4 sm:$0xf]   ;;  %v54_v1 = vld [vmem:[%s99_s0 + $0x2] ss:$4 sm:$0xf]  }
   0x2   :  { %7 = vrot.lane.b32.xlu0 %v53_v0, %s62_s8  ;;  %v55_v2 = vld [vmem:[%s99_s0 + $0x1] ss:$4 sm:$0xf]   ;;  %v2_v3 = vld [vmem:[%s99_s0] ss:$4 sm:$0xf]  }
   0x3   :  { %s63_s0 = smov 32   ;;  %4 = vst.msk [vmem:[#allocation0] ss:$8 sm:$0xf] %vm3_vm0, %v2_v3  }
   0x4   :  { %19 = vrot.lane.b32.xlu1 %v55_v2, %s63_s0 }
   0x6   :  { %13 = vrot.lane.b32.xlu0 %v54_v1, %s64_s15 }
  0x74   :  { %v8_v4 = vpop.permute.xlu0 %7  }
  0x75   :  { %10 = vst.msk [vmem:[#allocation0] ss:$8 sm:$0xf] %vm9_vm1, %v8_v4  }
  0x76   :  { %v20_v5 = vpop.permute.xlu1 %19  }
  0x78   :  { %v14_v6 = vpop.permute.xlu0 %13  }
  0x79   :  { %16 = vst.msk [vmem:[#allocation0] ss:$8 sm:$0xf] %vm15_vm2, %v14_v6  }
  0x7a   :  { %22 = vst.msk [vmem:[#allocation0] ss:$8 sm:$0xf] %vm21_vm3, %v20_v5  }
  0x81   :  { %v27_v7 = vld [vmem:[#allocation0] sm:$0x1]  ;;  %v32_v8 = vld [vmem:[#allocation0 + $0x8] sm:$0x1]  ;;  %v38_v9 = vld [vmem:[#allocation0 + $0x10] sm:$0x1] }
  0x82   :  { %30 = vst [vmem:[%s100_s1] sm:$0x1] %v27_v7  ;;  %56 = vst [vmem:[%s100_s1 + $0x1] sm:$0x1] %v32_v8  ;;  %v45_v10 = vld [vmem:[#allocation0 + $0x18] sm:$0x1] }
  0x83   :  { %57 = vst [vmem:[%s100_s1 + $0x2] sm:$0x1] %v38_v9  ;;  %58 = vst [vmem:[%s100_s1 + $0x3] sm:$0x1] %v45_v10 }

// kernel: nlayer_discriminator_forward.6
= control target key start
LH: loop header
LB: loop body
LE: loop exit
PB: predicated region body
PF: predicated region fallthrough
CT: control target
= control target key end

     0   :  { %v34_v5 = vlaneseq  ;;  %vm346_vm9 = vcmask 1040384   ;;  %vm348_vm10 = vcmask 1041408   ;;  %s619_s0 = inlined_call_operand.vmem [shape: bf16[18,256], index: 0, kind: input, shape index: {}]   ;;  %s620_s1 = inlined_call_operand.vmem [shape: f32[1,256], index: 1, kind: input, shape index: {}]   ;;  %s621_s2 = inlined_call_operand.vmem [shape: f32[1,256], index: 2, kind: input, shape index: {}]   ;;  %s622_s3 = inlined_call_operand.vmem [shape: bf16[256,128], index: 3, kind: input, shape index: {}]   ;;  %s623_s4 = inlined_call_operand.vmem [shape: bf16[18,128], index: 4, kind: output, shape index: {0}]   ;;  %s624_s5 = inlined_call_operand.vmem [shape: f32[8,128], index: 5, kind: output, shape index: {1}]  }
   0x1   :  { %v491_v0 = vld [vmem:[%s622_s3 + $0x78] sm:$0xff]   ;;  %v493_v2 = vld [vmem:[%s622_s3 + $0x70] sm:$0xff]   ;;  %v495_v4 = vld [vmem:[%s622_s3 + $0x68] sm:$0xff]  }
   0x2   :  { %v492_v1 = vld [vmem:[%s622_s3 + $0x38] sm:$0xff]   ;;  %447 = vmatprep.subr.bf16.mxu0 %v491_v0  ;;  %475 = vmatprep.subr.bf16.mxu1 %v491_v0  ;;  %v494_v3 = vld [vmem:[%s622_s3 + $0x30] sm:$0xff]   ;;  %v496_v6 = vld [vmem:[%s622_s3 + $0x28] sm:$0xff]   ;;  %v558_v8 = vshrl.u32 %v34_v5, 7 }
   0x3   :  { %448 = vmatpush3.bf16.msra.mxu0 %v492_v1  ;;  %483 = vmatpush3.bf16.msra.mxu1 %v492_v1  ;;  %v497_v7 = vld [vmem:[%s622_s3 + $0x60] sm:$0xff]   ;;  %v499_v10 = vld [vmem:[%s622_s3 + $0x58] sm:$0xff]   ;;  %v501_v14 = vld [vmem:[%s622_s3 + $0x50] sm:$0xff]  }
   0x4   :  { %449 = vmatprep.subr.bf16.mxu0 %v493_v2  ;;  %476 = vmatprep.subr.bf16.mxu1 %v493_v2  ;;  %v498_v9 = vld [vmem:[%s622_s3 + $0x20] sm:$0xff]   ;;  %v36_v11 = vsub.s32 0, %v558_v8  ;;  %v500_v12 = vld [vmem:[%s622_s3 + $0x18] sm:$0xff]   ;;  %v40_v13 = vsub.s32 1, %v558_v8  ;;  %v21_v16 = vld [vmem:[%s619_s0 + $0x8] sm:$0xff] }
   0x5   :  { %v20_v15 = vld [vmem:[%s619_s0] sm:$0xff]  ;;  %v26_v20 = vunpack.c.l.bf16 %v21_v16  ;;  %v27_v21 = vunpack.c.h.bf16 %v21_v16  ;;  %v22_v23 = vld [vmem:[%s619_s0 + $0x10] sm:$0xff]  ;;  %v23_v24 = vld [vmem:[%s619_s0 + $0x18] sm:$0xff] }
   0x6   :  { %v32_v17 = vld [vmem:[%s620_s1] sm:$0x3]  ;;  %v24_v18 = vunpack.c.l.bf16 %v20_v15  ;;  %v25_v19 = vunpack.c.h.bf16 %v20_v15  ;;  %v502_v29 = vld [vmem:[%s622_s3 + $0x10] sm:$0xff]   ;;  %v28_v30 = vunpack.c.l.bf16 %v22_v23  ;;  %v29_v31 = vunpack.c.h.bf16 %v22_v23  ;;  %v503_v34 = vld [vmem:[%s622_s3 + $0x48] sm:$0xff]  }
   0x7   :  { %450 = vmatpush3.bf16.msra.mxu0 %v494_v3  ;;  %484 = vmatpush3.bf16.msra.mxu1 %v494_v3  ;;  %v52_v22 = vld [vmem:[%s621_s2] sm:$0x3]  ;;  %v37_v25 = vrot.slane %v32_v17, %v36_v11  ;;  %v41_v26 = vrot.slane %v32_v17, %v40_v13  ;;  %v30_v32 = vunpack.c.l.bf16 %v23_v24  ;;  %v31_v33 = vunpack.c.h.bf16 %v23_v24  ;;  %v504_v46 = vld [vmem:[%s622_s3 + $0x8] sm:$0xff]  }
   0x8   :  { %451 = vmatprep.subr.bf16.mxu0 %v495_v4  ;;  %477 = vmatprep.subr.bf16.mxu1 %v495_v4  ;;  %v57_v27 = vrot.slane %v52_v22, %v36_v11  ;;  %v61_v28 = vrot.slane %v52_v22, %v40_v13  ;;  %v505_v47 = vld [vmem:[%s622_s3 + $0x40] sm:$0xff]  }
   0x9   :  { %v45_v35 = vmul.f32 %v41_v26, %v25_v19  ;;  %v47_v36 = vmul.f32 %v41_v26, %v27_v21  ;;  %v44_v37 = vmul.f32 %v37_v25, %v24_v18  ;;  %v49_v38 = vmul.f32 %v41_v26, %v29_v31  ;;  %v506_v57 = vld [vmem:[%s622_s3] sm:$0xff]  }
   0xa   :  { %v51_v39 = vmul.f32 %v41_v26, %v31_v33  ;;  %v46_v40 = vmul.f32 %v37_v25, %v26_v20  ;;  %v48_v41 = vmul.f32 %v37_v25, %v28_v30  ;;  %v50_v45 = vmul.f32 %v37_v25, %v30_v32 }
   0xb   :  { %452 = vmatpush3.bf16.msra.mxu0 %v496_v6  ;;  %485 = vmatpush3.bf16.msra.mxu1 %v496_v6  ;;  %v65_v42 = vadd.f32 %v61_v28, %v45_v35  ;;  %v67_v43 = vadd.f32 %v61_v28, %v47_v36  ;;  %v64_v44 = vadd.f32 %v57_v27, %v44_v37 }
   0xc   :  { %453 = vmatprep.subr.bf16.mxu0 %v497_v7  ;;  %478 = vmatprep.subr.bf16.mxu1 %v497_v7  ;;  %v69_v48 = vadd.f32 %v61_v28, %v49_v38  ;;  %v71_v49 = vadd.f32 %v61_v28, %v51_v39  ;;  %v66_v50 = vadd.f32 %v57_v27, %v46_v40 }
   0xd   :  { %vm73_vm0 = vcmp.ge.f32.partialorder %v65_v42, 0.0  ;;  %vm75_vm1 = vcmp.ge.f32.partialorder %v67_v43, 0.0  ;;  %v81_v51 = vmul.f32 0.2, %v65_v42  ;;  %v83_v52 = vmul.f32 0.2, %v67_v43 }
   0xe   :  { %vm77_vm2 = vcmp.ge.f32.partialorder %v69_v48, 0.0  ;;  %vm79_vm3 = vcmp.ge.f32.partialorder %v71_v49, 0.0  ;;  %v85_v53 = vmul.f32 0.2, %v69_v48  ;;  %v87_v54 = vmul.f32 0.2, %v71_v49 }
   0xf   :  { %454 = vmatpush3.bf16.msra.mxu0 %v498_v9  ;;  %486 = vmatpush3.bf16.msra.mxu1 %v498_v9  ;;  %v89_v55 = vsel %vm73_vm0, %v65_v42, %v81_v51  ;;  %v91_v56 = vsel %vm75_vm1, %v67_v43, %v83_v52  ;;  %vm72_vm4 = vcmp.ge.f32.partialorder %v64_v44, 0.0  ;;  %vm74_vm5 = vcmp.ge.f32.partialorder %v66_v50, 0.0 }
  0x10   :  { %455 = vmatprep.subr.bf16.mxu0 %v499_v10  ;;  %479 = vmatprep.subr.bf16.mxu1 %v499_v10  ;;  %v97_v58 = vpack.c.bf16 %v91_v56, %v89_v55  ;;  %v93_v59 = vsel %vm77_vm2, %v69_v48, %v85_v53  ;;  %v95_v60 = vsel %vm79_vm3, %v71_v49, %v87_v54  ;;  %v80_v61 = vmul.f32 0.2, %v64_v44 }
  0x11   :  { %v99_v62 = vpack.c.bf16 %v95_v60, %v93_v59  ;;  %v82_v63 = vmul.f32 0.2, %v66_v50  ;;  %v68_v0 = vadd.f32 %v57_v27, %v48_v41  ;;  %v70_v1 = vadd.f32 %v57_v27, %v50_v45 }
  0x12   :  { %260 = vmatprep.mubr.bf16.mxu0 %v97_v58  ;;  %v88_v2 = vsel %vm72_vm4, %v64_v44, %v80_v61 }
  0x13   :  { %456 = vmatpush3.bf16.msra.mxu0 %v500_v12  ;;  %487 = vmatpush3.bf16.msra.mxu1 %v500_v12  ;;  %v90_v3 = vsel %vm74_vm5, %v66_v50, %v82_v63  ;;  %vm76_vm6 = vcmp.ge.f32.partialorder %v68_v0, 0.0  ;;  %vm78_vm7 = vcmp.ge.f32.partialorder %v70_v1, 0.0  ;;  %v84_v4 = vmul.f32 0.2, %v68_v0 }
  0x14   :  { %457 = vmatprep.subr.bf16.mxu0 %v501_v14  ;;  %480 = vmatprep.subr.bf16.mxu1 %v501_v14  ;;  %v96_v5 = vpack.c.bf16 %v90_v3, %v88_v2  ;;  %v86_v6 = vmul.f32 0.2, %v70_v1  ;;  %v300_v12 = vadd.s32 16, %v558_v8 }
  0x15   :  { %268 = vmatprep.mubr.bf16.mxu1 %v99_v62  ;;  %v92_v7 = vsel %vm76_vm6, %v68_v0, %v84_v4 }
  0x16   :  { %v94_v9 = vsel %vm78_vm7, %v70_v1, %v86_v6  ;;  %vm310_vm8 = vcmp.lt.s32.totalorder %v300_v12, 18 }
  0x17   :  { %458 = vmatpush3.bf16.msra.mxu0 %v502_v29  ;;  %488 = vmatpush3.bf16.msra.mxu1 %v502_v29  ;;  %v98_v10 = vpack.c.bf16 %v94_v9, %v92_v7 }
  0x18   :  { %459 = vmatprep.subr.bf16.mxu0 %v503_v34  ;;  %481 = vmatprep.subr.bf16.mxu1 %v503_v34 }
  0x1b   :  { %460 = vmatpush3.bf16.msra.mxu0 %v504_v46  ;;  %489 = vmatpush3.bf16.msra.mxu1 %v504_v46 }
  0x1c   :  { %461 = vmatprep.subr.bf16.mxu0 %v505_v47  ;;  %482 = vmatprep.subr.bf16.mxu1 %v505_v47 }
  0x1f   :  { %462 = vmatpush3.bf16.msra.mxu0 %v506_v57  ;;  %490 = vmatpush3.bf16.msra.mxu1 %v506_v57 }
  0x22   :  { %261 = vmatmul.mubr.bf16.vlgmr.msra.gmra.mxu0 %v96_v5  ;;  %269 = vmatmul.mubr.bf16.vlgmr.msra.gmra.mxu1 %v98_v10 }
  0xe2   :  { %v463_v11 = vpop.f32.mrf.mxu0  ;;  %v469_v13 = vpop.f32.mrf.mxu1 }
  0xe4   :  { %v464_v14 = vpop.f32.mrf.mxu0  ;;  %v470_v16 = vpop.f32.mrf.mxu1 }
  0xe5   :  { %v465_v15 = vadd.f32 %v464_v14, %v463_v11  ;;  %v471_v18 = vadd.f32 %v470_v16, %v469_v13 }
  0xe6   :  { %v466_v17 = vpop.f32.mrf.mxu0  ;;  %v472_v19 = vpop.f32.mrf.mxu1 }
  0xe7   :  { %v333_v22 = vmul.f32 %v465_v15, %v465_v15  ;;  %v322_v23 = vsel %vm310_vm8, %v471_v18, 0.0 }
  0xe8   :  { %v467_v20 = vpop.f32.mrf.mxu0  ;;  %v473_v24 = vpop.f32.mrf.mxu1  ;;  %v335_v29 = vmul.f32 %v322_v23, %v322_v23 }
  0xe9   :  { %v468_v21 = vadd.f32 %v467_v20, %v466_v17  ;;  %v474_v28 = vadd.f32 %v473_v24, %v472_v19 }
  0xeb   :  { %v439_v25 = vpack.c.bf16 %v468_v21, %v465_v15  ;;  %v324_v26 = vadd.f32 %v468_v21, %v465_v15  ;;  %v334_v27 = vmul.f32 %v468_v21, %v468_v21  ;;  %v444_v31 = vpack.c.bf16 %v474_v28, %v471_v18 }
  0xed   :  { %440 = vst [vmem:[#allocation2] sm:$0xff] %v439_v25   ;;  %v325_v8 = vadd.f32 %v324_v26, %v322_v23  ;;  %v337_v30 = vadd.f32 %v334_v27, %v333_v22  ;;  %446 = vst [vmem:[#allocation2 + $0x8] sm:$0xff] %v444_v31  }
  0xef   :  { %v327_v32 = vrot.slane %v325_v8, 4  ;;  %v338_v33 = vadd.f32 %v337_v30, %v335_v29 }
  0xf1   :  { %v328_v34 = vadd.f32 %v327_v32, %v325_v8  ;;  %v340_v35 = vrot.slane %v338_v33, 4 }
  0xf3   :  { %v329_v36 = vrot.slane %v328_v34, 2  ;;  %v341_v37 = vadd.f32 %v340_v35, %v338_v33 }
  0xf4   :  { %v369_v38 = vld [vmem:[#allocation2] sm:$0xff]   ;;  %v373_v41 = vld [vmem:[#allocation2 + $0x8] sm:$0xf] }
  0xf5   :  { %v330_v39 = vadd.f32 %v329_v36, %v328_v34  ;;  %v342_v40 = vrot.slane %v341_v37, 2  ;;  %370 = vst [vmem:[%s623_s4] sm:$0xff] %v369_v38   ;;  %374 = vst [vmem:[%s623_s4 + $0x8] sm:$0xf] %v373_v41 }
  0xf7   :  { %v331_v42 = vrot.slane %v330_v39, 1  ;;  %v343_v43 = vadd.f32 %v342_v40, %v341_v37 }
  0xf9   :  { %v344_v44 = vrot.slane %v343_v43, 1  ;;  %v332_v45 = vadd.f32 %v331_v42, %v330_v39 }
  0xfb   :  { %v345_v46 = vadd.f32 %v344_v44, %v343_v43 }
  0xfd   :  { %v347_v47 = vsel %vm346_vm9, %v332_v45, %v345_v46 }
  0xfe   :  { %v349_v48 = vsel %vm348_vm10, %v347_v47, 0.0 }
  0xff   :  { %350 = vst [vmem:[%s624_s5] sm:$0xff] %v349_v48 }

// kernel: nlayer_discriminator_forward.7
= control target key start
LH: loop header
LB: loop body
LE: loop exit
PB: predicated region body
PF: predicated region fallthrough
CT: control target
= control target key end

     0   :  { %s269_s0 = inlined_call_operand.vmem [shape: bf16[8,512], index: 0, kind: input, shape index: {}]   ;;  %s270_s1 = inlined_call_operand.vmem [shape: f32[1,512], index: 1, kind: input, shape index: {}]   ;;  %s271_s2 = inlined_call_operand.vmem [shape: f32[1,512], index: 2, kind: input, shape index: {}]   ;;  %s272_s3 = inlined_call_operand.vmem [shape: f32[1,512], index: 3, kind: input, shape index: {}]   ;;  %s273_s4 = inlined_call_operand.<no memory space> [shape: f32[1,1], index: 4, kind: input, shape index: {}]   ;;  %s274_s5 = inlined_call_operand.vmem [shape: f32[8,1], index: 5, kind: output, shape index: {}]  }
   0x1   :  { %v10_v0 = vstv %s273_s4 }
   0x2   :  { %11 = vst [vmem:[#allocation2] sm:$0x1] %v10_v0 }
   0x3   :  { %v22_v1 = vld [vmem:[%s269_s0] sm:$0xff]  ;;  %v23_v2 = vld [vmem:[%s269_s0 + $0x8] sm:$0xff]  ;;  %v36_v3 = vlaneseq  ;;  %v24_v5 = vld [vmem:[%s269_s0 + $0x10] sm:$0xff]  ;;  %vm167_vm8 = vcmask 7168  }
   0x4   :  { %v25_v6 = vld [vmem:[%s269_s0 + $0x18] sm:$0xff]  ;;  %v26_v7 = vunpack.c.l.bf16 %v22_v1  ;;  %v27_v8 = vunpack.c.h.bf16 %v22_v1  ;;  %v28_v9 = vunpack.c.l.bf16 %v23_v2  ;;  %v29_v10 = vunpack.c.h.bf16 %v23_v2  ;;  %v34_v11 = vld [vmem:[%s270_s1] sm:$0xf] }
   0x5   :  { %v37_v4 = vshrl.u32 %v36_v3, 7  ;;  %v64_v16 = vld [vmem:[%s271_s2] sm:$0xf]  ;;  %v30_v17 = vunpack.c.l.bf16 %v24_v5  ;;  %v31_v18 = vunpack.c.h.bf16 %v24_v5  ;;  %v32_v19 = vunpack.c.l.bf16 %v25_v6 }
   0x6   :  { %v33_v20 = vunpack.c.h.bf16 %v25_v6  ;;  %v118_v25 = vld [vmem:[%s272_s3] sm:$0xf] }
   0x7   :  { %v38_v12 = vsub.s32 0, %v37_v4  ;;  %v42_v13 = vsub.s32 1, %v37_v4  ;;  %v46_v14 = vsub.s32 2, %v37_v4  ;;  %v50_v15 = vsub.s32 3, %v37_v4 }
   0x9   :  { %v39_v21 = vrot.slane %v34_v11, %v38_v12  ;;  %v43_v22 = vrot.slane %v34_v11, %v42_v13  ;;  %v47_v23 = vrot.slane %v34_v11, %v46_v14  ;;  %v51_v24 = vrot.slane %v34_v11, %v50_v15 }
   0xa   :  { %v69_v26 = vrot.slane %v64_v16, %v38_v12  ;;  %v73_v27 = vrot.slane %v64_v16, %v42_v13  ;;  %v77_v28 = vrot.slane %v64_v16, %v46_v14  ;;  %v81_v29 = vrot.slane %v64_v16, %v50_v15  ;;  %v211_v16 = vld [vmem:[#allocation2] ss:$0 sm:$0xff] }
   0xb   :  { %v56_v30 = vmul.f32 %v39_v21, %v26_v7  ;;  %v57_v31 = vmul.f32 %v43_v22, %v27_v8  ;;  %v58_v32 = vmul.f32 %v47_v23, %v28_v9  ;;  %v59_v33 = vmul.f32 %v51_v24, %v29_v10 }
   0xc   :  { %v123_v34 = vrot.slane %v118_v25, %v38_v12  ;;  %v127_v35 = vrot.slane %v118_v25, %v42_v13  ;;  %v131_v36 = vrot.slane %v118_v25, %v46_v14  ;;  %v135_v37 = vrot.slane %v118_v25, %v50_v15 }
   0xd   :  { %v86_v38 = vadd.f32 %v69_v26, %v56_v30  ;;  %v87_v39 = vadd.f32 %v73_v27, %v57_v31  ;;  %v88_v40 = vadd.f32 %v77_v28, %v58_v32  ;;  %v89_v41 = vadd.f32 %v81_v29, %v59_v33 }
   0xe   :  { %v60_v42 = vmul.f32 %v39_v21, %v30_v17  ;;  %v61_v43 = vmul.f32 %v43_v22, %v31_v18  ;;  %v62_v44 = vmul.f32 %v47_v23, %v32_v19  ;;  %v63_v45 = vmul.f32 %v51_v24, %v33_v20 }
   0xf   :  { %vm94_vm0 = vcmp.ge.f32.partialorder %v86_v38, 0.0  ;;  %vm95_vm1 = vcmp.ge.f32.partialorder %v87_v39, 0.0  ;;  %vm96_vm2 = vcmp.ge.f32.partialorder %v88_v40, 0.0  ;;  %vm97_vm3 = vcmp.ge.f32.partialorder %v89_v41, 0.0 }
  0x10   :  { %v102_v46 = vmul.f32 0.2, %v86_v38  ;;  %v103_v47 = vmul.f32 0.2, %v87_v39  ;;  %v104_v48 = vmul.f32 0.2, %v88_v40  ;;  %v90_v49 = vadd.f32 %v69_v26, %v60_v42 }
  0x11   :  { %v105_v50 = vmul.f32 0.2, %v89_v41  ;;  %v91_v51 = vadd.f32 %v73_v27, %v61_v43  ;;  %v92_v52 = vadd.f32 %v77_v28, %v62_v44  ;;  %v93_v53 = vadd.f32 %v81_v29, %v63_v45 }
  0x12   :  { %v110_v54 = vsel %vm94_vm0, %v86_v38, %v102_v46  ;;  %v111_v55 = vsel %vm95_vm1, %v87_v39, %v103_v47  ;;  %v112_v56 = vsel %vm96_vm2, %v88_v40, %v104_v48  ;;  %vm98_vm4 = vcmp.ge.f32.partialorder %v90_v49, 0.0 }
  0x13   :  { %v113_v57 = vsel %vm97_vm3, %v89_v41, %v105_v50  ;;  %v140_v58 = vmul.f32 %v123_v34, %v110_v54  ;;  %v141_v59 = vmul.f32 %v127_v35, %v111_v55  ;;  %v142_v60 = vmul.f32 %v131_v36, %v112_v56 }
  0x14   :  { %v143_v61 = vmul.f32 %v135_v37, %v113_v57  ;;  %vm99_vm5 = vcmp.ge.f32.partialorder %v91_v51, 0.0  ;;  %vm100_vm6 = vcmp.ge.f32.partialorder %v92_v52, 0.0  ;;  %vm101_vm7 = vcmp.ge.f32.partialorder %v93_v53, 0.0 }
  0x15   :  { %v148_v62 = vadd.f32 %v141_v59, %v140_v58  ;;  %v106_v63 = vmul.f32 0.2, %v90_v49  ;;  %v107_v0 = vmul.f32 0.2, %v91_v51  ;;  %v108_v1 = vmul.f32 0.2, %v92_v52 }
  0x16   :  { %v109_v2 = vmul.f32 0.2, %v93_v53 }
  0x17   :  { %v149_v3 = vadd.f32 %v148_v62, %v142_v60  ;;  %v114_v4 = vsel %vm98_vm4, %v90_v49, %v106_v63  ;;  %v115_v5 = vsel %vm99_vm5, %v91_v51, %v107_v0  ;;  %v116_v6 = vsel %vm100_vm6, %v92_v52, %v108_v1 }
  0x18   :  { %v117_v7 = vsel %vm101_vm7, %v93_v53, %v109_v2  ;;  %v144_v8 = vmul.f32 %v123_v34, %v114_v4  ;;  %v145_v9 = vmul.f32 %v127_v35, %v115_v5  ;;  %v146_v10 = vmul.f32 %v131_v36, %v116_v6 }
  0x19   :  { %v150_v11 = vadd.f32 %v149_v3, %v143_v61  ;;  %v147_v12 = vmul.f32 %v135_v37, %v117_v7 }
  0x1a   :  { %v153_v13 = vadd.f32 %v145_v9, %v144_v8 }
  0x1b   :  { %151 = vadd.xlane.f32.xlu0 %v150_v11 }
  0x1c   :  { %v154_v14 = vadd.f32 %v153_v13, %v146_v10 }
  0x1e   :  { %v155_v15 = vadd.f32 %v154_v14, %v147_v12 }
  0x20   :  { %156 = vadd.xlane.f32.xlu0 %v155_v15 }
  0xa4   :  { %v152_v17 = vpop.xlane.xlu0 %151 }
  0xa5   :  { %v165_v18 = vadd.f32 %v211_v16, %v152_v17 }
  0xa7   :  { %168 = vst.msk [vmem:[#allocation3] sm:$0xff] %vm167_vm8, %v165_v18 }
  0xa9   :  { %v157_v19 = vpop.xlane.xlu0 %156 }
  0xae   :  { %v200_v20 = vld [vmem:[#allocation3] sm:$0xff] }
  0xaf   :  { %201 = vst [vmem:[%s274_s5] sm:$0xff] %v200_v20 }

</bundles_post_ra>
